<compile_context>
chip_gen: v7x
topology: tpu7x:2x2x1
jax: 0.10.0
libtpu: 0.0.40
codegen_flags: <defaults>
</compile_context>

<pallas_src>
import math

import numpy as np
import jax
import jax.numpy as jnp
from jax.experimental import pallas as pl
from jax.experimental.pallas import tpu as pltpu


def _round_up(x, m):
    return ((x + m - 1) // m) * m


def actor_kernel(x_ref, w1_ref, b1_ref, w2_ref, b2_ref, wh_ref, bh_ref,
                 lo_ref, hi_ref, out_ref):
    cd = w1_ref.dtype  # bf16 compute dtype for the MXU operands

    # hidden layer 1 + ReLU (f32 accumulate / epilogue)
    x = x_ref[...].astype(cd)
    h1 = jnp.dot(x, w1_ref[...], preferred_element_type=jnp.float32) + b1_ref[...]
    h1 = jnp.maximum(h1, 0.0).astype(cd)

    # hidden layer 2 + ReLU
    h2 = jnp.dot(h1, w2_ref[...], preferred_element_type=jnp.float32) + b2_ref[...]
    h2 = jnp.maximum(h2, 0.0).astype(cd)

    # fused heads: [mean | log_std | zero-padding] in one lane-dense matmul
    out = jnp.dot(h2, wh_ref[...], preferred_element_type=jnp.float32) + bh_ref[...]

    # clamp only the log_std lanes via resident bound rows (mean lanes get
    # -inf/+inf bounds, so min/max is a no-op there)
    out = jnp.minimum(jnp.maximum(out, lo_ref[...]), hi_ref[...])

    out_ref[...] = out.astype(out_ref.dtype)


def prepare_actor_params(params, *, compute_dtype=jnp.bfloat16, hidden_multiple=128):
    """One-time prep: fuse heads, pad hidden/head dims, cast matmul weights."""
    state_dim, hidden = params["w1"].shape
    action_dim = params["wm"].shape[1]
    hp = _round_up(hidden, hidden_multiple)
    n_heads = 2 * action_dim
    n_pad = _round_up(n_heads, 128)

    def pad2(a, rows, cols):
        return jnp.pad(a, ((0, rows - a.shape[0]), (0, cols - a.shape[1])))

    w1 = pad2(params["w1"], state_dim, hp).astype(compute_dtype)
    b1 = pad2(params["b1"], 1, hp).astype(jnp.float32)
    w2 = pad2(params["w2"], hp, hp).astype(compute_dtype)
    b2 = pad2(params["b2"], 1, hp).astype(jnp.float32)
    wh = pad2(jnp.concatenate([params["wm"], params["ws"]], axis=1), hp, n_pad)
    bh = pad2(jnp.concatenate([params["bm"], params["bs"]], axis=1), 1, n_pad)
    wh = wh.astype(compute_dtype)
    bh = bh.astype(jnp.float32)

    lane = jnp.arange(n_pad)
    is_log_std = (lane >= action_dim) & (lane < n_heads)
    lo = jnp.where(is_log_std, -20.0, -jnp.inf).astype(jnp.float32).reshape(1, n_pad)
    hi = jnp.where(is_log_std, 2.0, jnp.inf).astype(jnp.float32).reshape(1, n_pad)

    return {
        "w1": w1, "b1": b1, "w2": w2, "b2": b2, "wh": wh, "bh": bh,
        "lo": lo, "hi": hi,
        "state_dim": state_dim, "action_dim": action_dim,
        "hidden_pad": hp, "n_pad": n_pad,
    }


def actor_forward(state, prepared, *, batch_tile=512, out_dtype=jnp.bfloat16):
    """Run the Actor forward pass in a Pallas kernel.

    state: [B, state_dim] float32
    prepared: output of prepare_actor_params
    returns: (mean [B, action_dim] f32, log_std [B, action_dim] f32)
    """
    B, Sd = state.shape
    assert Sd == prepared["state_dim"]
    action_dim = prepared["action_dim"]
    hp = prepared["hidden_pad"]
    n_pad = prepared["n_pad"]

    # batch tiling: multiple of 8, capped at batch_tile, and split into >= 2
    # grid steps when the batch allows it (so both v7x TensorCores get work)
    tb_cap = max(8, _round_up(batch_tile, 8))
    tb = min(tb_cap, _round_up(max(-(-B // 2), 8), 8))
    bp = _round_up(B, tb)
    x = state if bp == B else jnp.pad(state, ((0, bp - B), (0, 0)))
    grid = (bp // tb,)

    weight_args = (prepared["w1"], prepared["b1"], prepared["w2"], prepared["b2"],
                   prepared["wh"], prepared["bh"], prepared["lo"], prepared["hi"])

    out_isz = np.dtype(out_dtype).itemsize
    weight_bytes = sum(int(a.size) * a.dtype.itemsize for a in weight_args)

    # VMEM budget: double-buffered activation tiles + single-buffered resident
    # weights + f32 h1/h2 intermediates. Generation-aware cap (75% of VMEM).
    est_bytes = (2 * tb * Sd * 4            # pipelined input tile (f32)
                 + 2 * tb * n_pad * out_isz  # pipelined output tile
                 + weight_bytes              # resident weights/biases/bounds
                 + 2 * tb * hp * 4)          # h1 / h2 intermediates (f32)
    try:
        vmem_cap = int(pltpu.get_tpu_info().vmem_capacity_bytes)
    except Exception:
        vmem_cap = 64 * 1024 * 1024  # conservative: v7x per-TC physical VMEM
    cp_kwargs = dict(dimension_semantics=("parallel",))
    want = int(1.5 * est_bytes)
    if want > 16 * 1024 * 1024:  # smallest default scoped limit (v5e)
        cp_kwargs["vmem_limit_bytes"] = min(want, int(0.75 * vmem_cap))

    cost = pl.CostEstimate(
        flops=2 * bp * (Sd * hp + hp * hp + hp * n_pad),
        transcendentals=0,
        bytes_accessed=bp * Sd * 4 + weight_bytes + bp * n_pad * out_isz,
    )

    def build(weight_pipeline_mode):
        def rspec(a):
            # full-array block, constant index map -> resident across steps
            if weight_pipeline_mode is None:
                return pl.BlockSpec(a.shape, lambda i: (0, 0))
            return pl.BlockSpec(a.shape, lambda i: (0, 0),
                                pipeline_mode=weight_pipeline_mode)
        return pl.pallas_call(
            actor_kernel,
            out_shape=jax.ShapeDtypeStruct((bp, n_pad), out_dtype),
            grid=grid,
            in_specs=[pl.BlockSpec((tb, Sd), lambda i: (i, 0))]
                     + [rspec(a) for a in weight_args],
            out_specs=pl.BlockSpec((tb, n_pad), lambda i: (i, 0)),
            compiler_params=pltpu.CompilerParams(**cp_kwargs),
            cost_estimate=cost,
        )

    try:
        # Resident operands never change block index -> single-buffer them.
        out = build(pl.Buffered(1))(x, *weight_args)
    except Exception:
        # Fallback if this jax build rejects pipeline_mode / Buffered(1).
        out = build(None)(x, *weight_args)

    mean = out[:B, :action_dim].astype(jnp.float32)
    log_std = out[:B, action_dim:2 * action_dim].astype(jnp.float32)
    return mean, log_std


def init_actor_params(key, state_dim, action_dim, hidden_dim):
    """Xavier-uniform weights, zero biases (matches Actor._init_weights)."""
    def xavier(k, fan_in, fan_out):
        limit = math.sqrt(6.0 / (fan_in + fan_out))
        # stored as (in, out) for x @ W
        return jax.random.uniform(k, (fan_in, fan_out), jnp.float32,
                                  minval=-limit, maxval=limit)

    k1, k2, k3, k4 = jax.random.split(key, 4)
    return {
        "w1": xavier(k1, state_dim, hidden_dim),
        "b1": jnp.zeros((1, hidden_dim), jnp.float32),
        "w2": xavier(k2, hidden_dim, hidden_dim),
        "b2": jnp.zeros((1, hidden_dim), jnp.float32),
        "wm": xavier(k3, hidden_dim, action_dim),
        "bm": jnp.zeros((1, action_dim), jnp.float32),
        "ws": xavier(k4, hidden_dim, action_dim),
        "bs": jnp.zeros((1, action_dim), jnp.float32),
    }


def actor_forward_ref(state, p):
    """Pure f32 reference with PyTorch-forward semantics."""
    h1 = jnp.maximum(state @ p["w1"] + p["b1"], 0.0)
    h2 = jnp.maximum(h1 @ p["w2"] + p["b2"], 0.0)
    mean = h2 @ p["wm"] + p["bm"]
    log_std = jnp.clip(h2 @ p["ws"] + p["bs"], -20.0, 2.0)
    return mean, log_std


def actor_forward_matched_ref(state, prepared, out_dtype=jnp.bfloat16):
    """Reference with the same bf16-operand / f32-accumulate precision."""
    cd = prepared["w1"].dtype
    a = prepared["action_dim"]
    h1 = jnp.maximum(jnp.dot(state.astype(cd), prepared["w1"],
                             preferred_element_type=jnp.float32) + prepared["b1"], 0.0)
    h2 = jnp.maximum(jnp.dot(h1.astype(cd), prepared["w2"],
                             preferred_element_type=jnp.float32) + prepared["b2"], 0.0)
    out = jnp.dot(h2.astype(cd), prepared["wh"],
                  preferred_element_type=jnp.float32) + prepared["bh"]
    out = jnp.minimum(jnp.maximum(out, prepared["lo"]), prepared["hi"])
    out = out.astype(out_dtype).astype(jnp.float32)
    return out[:, :a], out[:, a:2 * a]


if __name__ == "__main__":
    # small, deterministic shapes consistent with the module
    state_dim, action_dim, hidden_dim = 16, 4, 32

    key = jax.random.PRNGKey(0)
    k_state, k_state2, k_params = jax.random.split(key, 3)
    raw_params = init_actor_params(k_params, state_dim, action_dim, hidden_dim)
    prepared = prepare_actor_params(raw_params)

    # case 1: batch divisible by 8; case 2: ragged batch (pad + 2 grid steps)
    for batch, ks in ((8, k_state), (13, k_state2)):
        state = jax.random.normal(ks, (batch, state_dim), jnp.float32)
        mean, log_std = actor_forward(state, prepared)
        jax.block_until_ready((mean, log_std))

        assert mean.shape == (batch, action_dim)
        assert log_std.shape == (batch, action_dim)
        assert jnp.all(log_std >= -20.0) and jnp.all(log_std <= 2.0)

        # tight check vs a precision-matched (bf16-operand) reference
        mean_m, log_std_m = actor_forward_matched_ref(state, prepared)
        assert jnp.allclose(mean, mean_m, atol=2.5e-2, rtol=2.5e-2)
        assert jnp.allclose(log_std, log_std_m, atol=2.5e-2, rtol=2.5e-2)

        # loose check vs the pure-f32 PyTorch-semantics reference
        mean_f, log_std_f = actor_forward_ref(state, raw_params)
        assert jnp.allclose(mean, mean_f, atol=1e-1, rtol=1e-1)
        assert jnp.allclose(log_std, log_std_f, atol=1e-1, rtol=1e-1)

    # TODO(synk): the `sample()` method (rsample + tanh squash + log_prob) is
    # stochastic host-side logic and is intentionally not part of the kernel.

    print("KERNEL_OK")
</pallas_src>

<mosaic_0001>
module attributes {stable_mosaic.version = 11 : i64} {
  func.func @actor_kernel(%arg0: i32, %arg1: memref<8x16xf32, #tpu.memory_space<vmem>>, %arg2: memref<16x128xbf16, #tpu.memory_space<vmem>>, %arg3: memref<1x128xf32, #tpu.memory_space<vmem>>, %arg4: memref<128x128xbf16, #tpu.memory_space<vmem>>, %arg5: memref<1x128xf32, #tpu.memory_space<vmem>>, %arg6: memref<128x128xbf16, #tpu.memory_space<vmem>>, %arg7: memref<1x128xf32, #tpu.memory_space<vmem>>, %arg8: memref<1x128xf32, #tpu.memory_space<vmem>>, %arg9: memref<1x128xf32, #tpu.memory_space<vmem>>, %arg10: memref<8x128xbf16, #tpu.memory_space<vmem>>) attributes {dimension_semantics = [#tpu.dimension_semantics<parallel>], iteration_bounds = array<i64: 1>, scalar_prefetch = 0 : i64, scratch_operands = 0 : i64, tpu.core_type = #tpu.core_type<tc>, window_params = [{transform_indices = @transform_0, window_bounds = array<i64: 8, 16>}, {pipeline_mode = #tpu.pipeline_mode<synchronous>, transform_indices = @transform_1, window_bounds = array<i64: 16, 128>}, {pipeline_mode = #tpu.pipeline_mode<synchronous>, transform_indices = @transform_2, window_bounds = array<i64: 1, 128>}, {pipeline_mode = #tpu.pipeline_mode<synchronous>, transform_indices = @transform_3, window_bounds = array<i64: 128, 128>}, {pipeline_mode = #tpu.pipeline_mode<synchronous>, transform_indices = @transform_4, window_bounds = array<i64: 1, 128>}, {pipeline_mode = #tpu.pipeline_mode<synchronous>, transform_indices = @transform_5, window_bounds = array<i64: 128, 128>}, {pipeline_mode = #tpu.pipeline_mode<synchronous>, transform_indices = @transform_6, window_bounds = array<i64: 1, 128>}, {pipeline_mode = #tpu.pipeline_mode<synchronous>, transform_indices = @transform_7, window_bounds = array<i64: 1, 128>}, {pipeline_mode = #tpu.pipeline_mode<synchronous>, transform_indices = @transform_8, window_bounds = array<i64: 1, 128>}, {transform_indices = @transform_9, window_bounds = array<i64: 8, 128>}]} {
    %c0 = arith.constant 0 : index
    %c0_0 = arith.constant 0 : index
    %0 = vector.load %arg1[%c0, %c0_0] : memref<8x16xf32, #tpu.memory_space<vmem>>, vector<8x16xf32>
    %1 = arith.truncf %0 : vector<8x16xf32> to vector<8x16xbf16>
    %c0_1 = arith.constant 0 : index
    %c0_2 = arith.constant 0 : index
    %2 = vector.load %arg2[%c0_1, %c0_2] : memref<16x128xbf16, #tpu.memory_space<vmem>>, vector<16x128xbf16>
    %cst = arith.constant dense<0.000000e+00> : vector<8x128xf32>
    %3 = tpu.matmul %1, %2, %cst {dimension_numbers = #tpu.dot_dimension_numbers<[1], [0], [0], [1], [0, 0, 1, 1], [], []>} : vector<8x16xbf16>, vector<16x128xbf16>, vector<8x128xf32> -> vector<8x128xf32>
    %c0_3 = arith.constant 0 : index
    %c0_4 = arith.constant 0 : index
    %4 = vector.load %arg3[%c0_3, %c0_4] : memref<1x128xf32, #tpu.memory_space<vmem>>, vector<1x128xf32>
    %5 = vector.broadcast %4 : vector<1x128xf32> to vector<8x128xf32>
    %6 = arith.addf %3, %5 : vector<8x128xf32>
    %cst_5 = arith.constant 0.000000e+00 : f32
    %7 = vector.broadcast %cst_5 : f32 to vector<8x128xf32>
    %8 = arith.maximumf %6, %7 : vector<8x128xf32>
    %9 = arith.truncf %8 : vector<8x128xf32> to vector<8x128xbf16>
    %c0_6 = arith.constant 0 : index
    %c0_7 = arith.constant 0 : index
    %10 = vector.load %arg4[%c0_6, %c0_7] : memref<128x128xbf16, #tpu.memory_space<vmem>>, vector<128x128xbf16>
    %cst_8 = arith.constant dense<0.000000e+00> : vector<8x128xf32>
    %11 = tpu.matmul %9, %10, %cst_8 {dimension_numbers = #tpu.dot_dimension_numbers<[1], [0], [0], [1], [0, 0, 1, 1], [], []>} : vector<8x128xbf16>, vector<128x128xbf16>, vector<8x128xf32> -> vector<8x128xf32>
    %c0_9 = arith.constant 0 : index
    %c0_10 = arith.constant 0 : index
    %12 = vector.load %arg5[%c0_9, %c0_10] : memref<1x128xf32, #tpu.memory_space<vmem>>, vector<1x128xf32>
    %13 = vector.broadcast %12 : vector<1x128xf32> to vector<8x128xf32>
    %14 = arith.addf %11, %13 : vector<8x128xf32>
    %cst_11 = arith.constant 0.000000e+00 : f32
    %15 = vector.broadcast %cst_11 : f32 to vector<8x128xf32>
    %16 = arith.maximumf %14, %15 : vector<8x128xf32>
    %17 = arith.truncf %16 : vector<8x128xf32> to vector<8x128xbf16>
    %c0_12 = arith.constant 0 : index
    %c0_13 = arith.constant 0 : index
    %18 = vector.load %arg6[%c0_12, %c0_13] : memref<128x128xbf16, #tpu.memory_space<vmem>>, vector<128x128xbf16>
    %cst_14 = arith.constant dense<0.000000e+00> : vector<8x128xf32>
    %19 = tpu.matmul %17, %18, %cst_14 {dimension_numbers = #tpu.dot_dimension_numbers<[1], [0], [0], [1], [0, 0, 1, 1], [], []>} : vector<8x128xbf16>, vector<128x128xbf16>, vector<8x128xf32> -> vector<8x128xf32>
    %c0_15 = arith.constant 0 : index
    %c0_16 = arith.constant 0 : index
    %20 = vector.load %arg7[%c0_15, %c0_16] : memref<1x128xf32, #tpu.memory_space<vmem>>, vector<1x128xf32>
    %21 = vector.broadcast %20 : vector<1x128xf32> to vector<8x128xf32>
    %22 = arith.addf %19, %21 : vector<8x128xf32>
    %c0_17 = arith.constant 0 : index
    %c0_18 = arith.constant 0 : index
    %23 = vector.load %arg8[%c0_17, %c0_18] : memref<1x128xf32, #tpu.memory_space<vmem>>, vector<1x128xf32>
    %24 = vector.broadcast %23 : vector<1x128xf32> to vector<8x128xf32>
    %25 = arith.maximumf %22, %24 : vector<8x128xf32>
    %c0_19 = arith.constant 0 : index
    %c0_20 = arith.constant 0 : index
    %26 = vector.load %arg9[%c0_19, %c0_20] : memref<1x128xf32, #tpu.memory_space<vmem>>, vector<1x128xf32>
    %27 = vector.broadcast %26 : vector<1x128xf32> to vector<8x128xf32>
    %28 = arith.minimumf %25, %27 : vector<8x128xf32>
    %29 = arith.truncf %28 : vector<8x128xf32> to vector<8x128xbf16>
    %c0_21 = arith.constant 0 : index
    %c0_22 = arith.constant 0 : index
    %30 = vector.load %arg10[%c0_21, %c0_22] : memref<8x128xbf16, #tpu.memory_space<vmem>>, vector<8x128xbf16>
    tpu.vector_store %arg10[%c0_21, %c0_22], %29 {strides = array<i32>} : memref<8x128xbf16, #tpu.memory_space<vmem>>, vector<8x128xbf16>,
    return
  }
  func.func @transform_0(%arg0: i32) -> (i32, i32) {
    %c0_i32 = arith.constant 0 : i32
    %c0_i32_0 = arith.constant 0 : i32
    return %arg0, %c0_i32 : i32, i32
  }
  func.func @transform_1(%arg0: i32) -> (i32, i32) {
    %c0_i32 = arith.constant 0 : i32
    %c0_i32_0 = arith.constant 0 : i32
    %c0_i32_1 = arith.constant 0 : i32
    return %c0_i32, %c0_i32_0 : i32, i32
  }
  func.func @transform_2(%arg0: i32) -> (i32, i32) {
    %c0_i32 = arith.constant 0 : i32
    %c0_i32_0 = arith.constant 0 : i32
    %c0_i32_1 = arith.constant 0 : i32
    return %c0_i32, %c0_i32_0 : i32, i32
  }
  func.func @transform_3(%arg0: i32) -> (i32, i32) {
    %c0_i32 = arith.constant 0 : i32
    %c0_i32_0 = arith.constant 0 : i32
    %c0_i32_1 = arith.constant 0 : i32
    return %c0_i32, %c0_i32_0 : i32, i32
  }
  func.func @transform_4(%arg0: i32) -> (i32, i32) {
    %c0_i32 = arith.constant 0 : i32
    %c0_i32_0 = arith.constant 0 : i32
    %c0_i32_1 = arith.constant 0 : i32
    return %c0_i32, %c0_i32_0 : i32, i32
  }
  func.func @transform_5(%arg0: i32) -> (i32, i32) {
    %c0_i32 = arith.constant 0 : i32
    %c0_i32_0 = arith.constant 0 : i32
    %c0_i32_1 = arith.constant 0 : i32
    return %c0_i32, %c0_i32_0 : i32, i32
  }
  func.func @transform_6(%arg0: i32) -> (i32, i32) {
    %c0_i32 = arith.constant 0 : i32
    %c0_i32_0 = arith.constant 0 : i32
    %c0_i32_1 = arith.constant 0 : i32
    return %c0_i32, %c0_i32_0 : i32, i32
  }
  func.func @transform_7(%arg0: i32) -> (i32, i32) {
    %c0_i32 = arith.constant 0 : i32
    %c0_i32_0 = arith.constant 0 : i32
    %c0_i32_1 = arith.constant 0 : i32
    return %c0_i32, %c0_i32_0 : i32, i32
  }
  func.func @transform_8(%arg0: i32) -> (i32, i32) {
    %c0_i32 = arith.constant 0 : i32
    %c0_i32_0 = arith.constant 0 : i32
    %c0_i32_1 = arith.constant 0 : i32
    return %c0_i32, %c0_i32_0 : i32, i32
  }
  func.func @transform_9(%arg0: i32) -> (i32, i32) {
    %c0_i32 = arith.constant 0 : i32
    %c0_i32_0 = arith.constant 0 : i32
    return %arg0, %c0_i32 : i32, i32
  }
}

module attributes {stable_mosaic.version = 11 : i64} {
  func.func @actor_kernel(%arg0: i32, %arg1: memref<8x16xf32, #tpu.memory_space<vmem>>, %arg2: memref<16x128xbf16, #tpu.memory_space<vmem>>, %arg3: memref<1x128xf32, #tpu.memory_space<vmem>>, %arg4: memref<128x128xbf16, #tpu.memory_space<vmem>>, %arg5: memref<1x128xf32, #tpu.memory_space<vmem>>, %arg6: memref<128x128xbf16, #tpu.memory_space<vmem>>, %arg7: memref<1x128xf32, #tpu.memory_space<vmem>>, %arg8: memref<1x128xf32, #tpu.memory_space<vmem>>, %arg9: memref<1x128xf32, #tpu.memory_space<vmem>>, %arg10: memref<8x128xbf16, #tpu.memory_space<vmem>>) attributes {dimension_semantics = [#tpu.dimension_semantics<parallel>], iteration_bounds = array<i64: 1>, scalar_prefetch = 0 : i64, scratch_operands = 0 : i64, tpu.core_type = #tpu.core_type<tc>, window_params = [{transform_indices = @transform_0, window_bounds = array<i64: 8, 16>}, {pipeline_mode = #tpu.pipeline_mode<synchronous>, transform_indices = @transform_1, window_bounds = array<i64: 16, 128>}, {pipeline_mode = #tpu.pipeline_mode<synchronous>, transform_indices = @transform_2, window_bounds = array<i64: 1, 128>}, {pipeline_mode = #tpu.pipeline_mode<synchronous>, transform_indices = @transform_3, window_bounds = array<i64: 128, 128>}, {pipeline_mode = #tpu.pipeline_mode<synchronous>, transform_indices = @transform_4, window_bounds = array<i64: 1, 128>}, {pipeline_mode = #tpu.pipeline_mode<synchronous>, transform_indices = @transform_5, window_bounds = array<i64: 128, 128>}, {pipeline_mode = #tpu.pipeline_mode<synchronous>, transform_indices = @transform_6, window_bounds = array<i64: 1, 128>}, {pipeline_mode = #tpu.pipeline_mode<synchronous>, transform_indices = @transform_7, window_bounds = array<i64: 1, 128>}, {pipeline_mode = #tpu.pipeline_mode<synchronous>, transform_indices = @transform_8, window_bounds = array<i64: 1, 128>}, {transform_indices = @transform_9, window_bounds = array<i64: 8, 128>}]} {
    %c0 = arith.constant 0 : index
    %c0_0 = arith.constant 0 : index
    %0 = vector.load %arg1[%c0, %c0_0] : memref<8x16xf32, #tpu.memory_space<vmem>>, vector<8x16xf32>
    %1 = arith.truncf %0 : vector<8x16xf32> to vector<8x16xbf16>
    %c0_1 = arith.constant 0 : index
    %c0_2 = arith.constant 0 : index
    %2 = vector.load %arg2[%c0_1, %c0_2] : memref<16x128xbf16, #tpu.memory_space<vmem>>, vector<16x128xbf16>
    %cst = arith.constant dense<0.000000e+00> : vector<8x128xf32>
    %3 = tpu.matmul %1, %2, %cst {dimension_numbers = #tpu.dot_dimension_numbers<[1], [0], [0], [1], [0, 0, 1, 1], [], []>} : vector<8x16xbf16>, vector<16x128xbf16>, vector<8x128xf32> -> vector<8x128xf32>
    %c0_3 = arith.constant 0 : index
    %c0_4 = arith.constant 0 : index
    %4 = vector.load %arg3[%c0_3, %c0_4] : memref<1x128xf32, #tpu.memory_space<vmem>>, vector<1x128xf32>
    %5 = vector.broadcast %4 : vector<1x128xf32> to vector<8x128xf32>
    %6 = arith.addf %3, %5 : vector<8x128xf32>
    %cst_5 = arith.constant 0.000000e+00 : f32
    %7 = vector.broadcast %cst_5 : f32 to vector<8x128xf32>
    %8 = arith.maximumf %6, %7 : vector<8x128xf32>
    %9 = arith.truncf %8 : vector<8x128xf32> to vector<8x128xbf16>
    %c0_6 = arith.constant 0 : index
    %c0_7 = arith.constant 0 : index
    %10 = vector.load %arg4[%c0_6, %c0_7] : memref<128x128xbf16, #tpu.memory_space<vmem>>, vector<128x128xbf16>
    %cst_8 = arith.constant dense<0.000000e+00> : vector<8x128xf32>
    %11 = tpu.matmul %9, %10, %cst_8 {dimension_numbers = #tpu.dot_dimension_numbers<[1], [0], [0], [1], [0, 0, 1, 1], [], []>} : vector<8x128xbf16>, vector<128x128xbf16>, vector<8x128xf32> -> vector<8x128xf32>
    %c0_9 = arith.constant 0 : index
    %c0_10 = arith.constant 0 : index
    %12 = vector.load %arg5[%c0_9, %c0_10] : memref<1x128xf32, #tpu.memory_space<vmem>>, vector<1x128xf32>
    %13 = vector.broadcast %12 : vector<1x128xf32> to vector<8x128xf32>
    %14 = arith.addf %11, %13 : vector<8x128xf32>
    %cst_11 = arith.constant 0.000000e+00 : f32
    %15 = vector.broadcast %cst_11 : f32 to vector<8x128xf32>
    %16 = arith.maximumf %14, %15 : vector<8x128xf32>
    %17 = arith.truncf %16 : vector<8x128xf32> to vector<8x128xbf16>
    %c0_12 = arith.constant 0 : index
    %c0_13 = arith.constant 0 : index
    %18 = vector.load %arg6[%c0_12, %c0_13] : memref<128x128xbf16, #tpu.memory_space<vmem>>, vector<128x128xbf16>
    %cst_14 = arith.constant dense<0.000000e+00> : vector<8x128xf32>
    %19 = tpu.matmul %17, %18, %cst_14 {dimension_numbers = #tpu.dot_dimension_numbers<[1], [0], [0], [1], [0, 0, 1, 1], [], []>} : vector<8x128xbf16>, vector<128x128xbf16>, vector<8x128xf32> -> vector<8x128xf32>
    %c0_15 = arith.constant 0 : index
    %c0_16 = arith.constant 0 : index
    %20 = vector.load %arg7[%c0_15, %c0_16] : memref<1x128xf32, #tpu.memory_space<vmem>>, vector<1x128xf32>
    %21 = vector.broadcast %20 : vector<1x128xf32> to vector<8x128xf32>
    %22 = arith.addf %19, %21 : vector<8x128xf32>
    %c0_17 = arith.constant 0 : index
    %c0_18 = arith.constant 0 : index
    %23 = vector.load %arg8[%c0_17, %c0_18] : memref<1x128xf32, #tpu.memory_space<vmem>>, vector<1x128xf32>
    %24 = vector.broadcast %23 : vector<1x128xf32> to vector<8x128xf32>
    %25 = arith.maximumf %22, %24 : vector<8x128xf32>
    %c0_19 = arith.constant 0 : index
    %c0_20 = arith.constant 0 : index
    %26 = vector.load %arg9[%c0_19, %c0_20] : memref<1x128xf32, #tpu.memory_space<vmem>>, vector<1x128xf32>
    %27 = vector.broadcast %26 : vector<1x128xf32> to vector<8x128xf32>
    %28 = arith.minimumf %25, %27 : vector<8x128xf32>
    %29 = arith.truncf %28 : vector<8x128xf32> to vector<8x128xbf16>
    %c0_21 = arith.constant 0 : index
    %c0_22 = arith.constant 0 : index
    %30 = vector.load %arg10[%c0_21, %c0_22] : memref<8x128xbf16, #tpu.memory_space<vmem>>, vector<8x128xbf16>
    tpu.vector_store %arg10[%c0_21, %c0_22], %29 {strides = array<i32>} : memref<8x128xbf16, #tpu.memory_space<vmem>>, vector<8x128xbf16>,
    return
  }
  func.func @transform_0(%arg0: i32) -> (i32, i32) {
    %c0_i32 = arith.constant 0 : i32
    %c0_i32_0 = arith.constant 0 : i32
    return %arg0, %c0_i32 : i32, i32
  }
  func.func @transform_1(%arg0: i32) -> (i32, i32) {
    %c0_i32 = arith.constant 0 : i32
    %c0_i32_0 = arith.constant 0 : i32
    %c0_i32_1 = arith.constant 0 : i32
    return %c0_i32, %c0_i32_0 : i32, i32
  }
  func.func @transform_2(%arg0: i32) -> (i32, i32) {
    %c0_i32 = arith.constant 0 : i32
    %c0_i32_0 = arith.constant 0 : i32
    %c0_i32_1 = arith.constant 0 : i32
    return %c0_i32, %c0_i32_0 : i32, i32
  }
  func.func @transform_3(%arg0: i32) -> (i32, i32) {
    %c0_i32 = arith.constant 0 : i32
    %c0_i32_0 = arith.constant 0 : i32
    %c0_i32_1 = arith.constant 0 : i32
    return %c0_i32, %c0_i32_0 : i32, i32
  }
  func.func @transform_4(%arg0: i32) -> (i32, i32) {
    %c0_i32 = arith.constant 0 : i32
    %c0_i32_0 = arith.constant 0 : i32
    %c0_i32_1 = arith.constant 0 : i32
    return %c0_i32, %c0_i32_0 : i32, i32
  }
  func.func @transform_5(%arg0: i32) -> (i32, i32) {
    %c0_i32 = arith.constant 0 : i32
    %c0_i32_0 = arith.constant 0 : i32
    %c0_i32_1 = arith.constant 0 : i32
    return %c0_i32, %c0_i32_0 : i32, i32
  }
  func.func @transform_6(%arg0: i32) -> (i32, i32) {
    %c0_i32 = arith.constant 0 : i32
    %c0_i32_0 = arith.constant 0 : i32
    %c0_i32_1 = arith.constant 0 : i32
    return %c0_i32, %c0_i32_0 : i32, i32
  }
  func.func @transform_7(%arg0: i32) -> (i32, i32) {
    %c0_i32 = arith.constant 0 : i32
    %c0_i32_0 = arith.constant 0 : i32
    %c0_i32_1 = arith.constant 0 : i32
    return %c0_i32, %c0_i32_0 : i32, i32
  }
  func.func @transform_8(%arg0: i32) -> (i32, i32) {
    %c0_i32 = arith.constant 0 : i32
    %c0_i32_0 = arith.constant 0 : i32
    %c0_i32_1 = arith.constant 0 : i32
    return %c0_i32, %c0_i32_0 : i32, i32
  }
  func.func @transform_9(%arg0: i32) -> (i32, i32) {
    %c0_i32 = arith.constant 0 : i32
    %c0_i32_0 = arith.constant 0 : i32
    return %arg0, %c0_i32 : i32, i32
  }
}

</mosaic_0001>

<bundles_post_ra>
// kernel: tpu_custom_call.1
= control target key start
LH: loop header
LB: loop body
LE: loop exit
PB: predicated region body
PF: predicated region fallthrough
CT: control target
= control target key end

     0   :  { %14 = vsyncpa [#allocation3], 0  ;;  %s805_s0 = inlined_call_operand.hbm [shape: f32[8,16], index: 0, kind: input, shape index: {}]   ;;  %s806_s1 = inlined_call_operand.hbm [shape: bf16[16,128], index: 1, kind: input, shape index: {}]   ;;  %s807_s2 = inlined_call_operand.vmem [shape: f32[1,128], index: 2, kind: input, shape index: {}]   ;;  %s808_s3 = inlined_call_operand.hbm [shape: bf16[128,128], index: 3, kind: input, shape index: {}]   ;;  %s809_s4 = inlined_call_operand.vmem [shape: f32[1,128], index: 4, kind: input, shape index: {}]   ;;  %s810_s5 = inlined_call_operand.hbm [shape: bf16[128,128], index: 5, kind: input, shape index: {}]   ;;  %s811_s6 = inlined_call_operand.vmem [shape: f32[1,128], index: 6, kind: input, shape index: {}]   ;;  %s812_s7 = inlined_call_operand.vmem [shape: f32[1,128], index: 7, kind: input, shape index: {}]   ;;  %s813_s8 = inlined_call_operand.vmem [shape: f32[1,128], index: 8, kind: input, shape index: {}]   ;;  %s814_s9 = inlined_call_operand.hbm [shape: bf16[8,128], index: 9, kind: output, shape index: {}]  }
   0x1   :  { %15 = vsyncpa [#allocation6], 0 }
   0x2   :  { %16 = vsyncpa [#allocation9], 0 }
   0x3   :  { %17 = vsyncpa [#allocation4], 0  ;;  %s642_s30 = smov [#allocation5]   ;;  %s524_s13 = scalar_lea.hbm %s806_s1, 128 }
   0x4   :  { %s33_s10 = sshll.u32 %s642_s30, 4  ;;  %p525_p0 = scmp.ne.s32.totalorder %s806_s1, %s524_s13  ;;  %s34_s10 = int_to_ptr.vmem [resolvable:$true] %s33_s10 }
   0x5   :  { %p528_p1 = scmp.lt.u32.totalorder %s524_s13, %s806_s1 }
   0x7   :  { %p530_p2 = pnand %p528_p1, %p525_p0 }
   0x9   :  { %533 = shalt.err (!%p530_p2)
}
   0xa   :  { %s534_s18 = scalar_lea.vmem %s34_s10, 128  ;;  %p539_p4 = scmp.lt.s32.totalorder %s34_s10, %s34_s10 }
   0xb   :  { %p535_p3 = scmp.ne.s32.totalorder %s34_s10, %s534_s18  ;;  %p540_p5 = scmp.lt.s32.totalorder %s534_s18, %s534_s18 }
   0xd   :  { %p541_p6 = por %p540_p5, %p539_p4 }
   0xf   :  { %p542_p7 = pnand %p541_p6, %p535_p3 }
  0x11   :  { %545 = shalt.err (!%p542_p7)
}
  0x12   :  { %s643_s19 = smov 64   ;;  %s644_s20 = smov 4  }
  0x13   :  { %39 = dma.hbm_to_vmem [thread:$0]  %s806_s1, 128, %s34_s10, [#allocation6], %s643_s19, %s643_s19, %s644_s20  }
  0x14   :  { %s645_s23 = smov [#allocation2]   ;;  %s646_s25 = smov [#allocation7]  }
  0x15   :  { %s24_s24 = sshll.u32 %s645_s23, 4  ;;  %s47_s26 = sshll.u32 %s646_s25, 4  ;;  %s25_s24 = int_to_ptr.vmem [resolvable:$true] %s24_s24  ;;  %s48_s26 = int_to_ptr.vmem [resolvable:$true] %s47_s26 }
  0x16   :  { %s546_s29 = scalar_lea.hbm %s805_s0, 128 }
  0x17   :  { %p547_p8 = scmp.ne.s32.totalorder %s805_s0, %s546_s29  ;;  %p550_p9 = scmp.lt.u32.totalorder %s546_s29, %s805_s0 }
  0x19   :  { %p552_p10 = pnand %p550_p9, %p547_p8 }
  0x1b   :  { %555 = shalt.err (!%p552_p10)
}
  0x1c   :  { %s556_s1 = scalar_lea.vmem %s25_s24, 128  ;;  %p561_p12 = scmp.lt.s32.totalorder %s25_s24, %s25_s24 }
  0x1d   :  { %p557_p11 = scmp.ne.s32.totalorder %s25_s24, %s556_s1  ;;  %p562_p13 = scmp.lt.s32.totalorder %s556_s1, %s556_s1 }
  0x1f   :  { %p563_p0 = por %p562_p13, %p561_p12 }
  0x21   :  { %p564_p1 = pnand %p563_p0, %p557_p11 }
  0x23   :  { %567 = shalt.err (!%p564_p1)
}
  0x24   :  { %27 = dma.hbm_to_vmem [thread:$0]  %s805_s0, 128, %s25_s24, [#allocation3]  }
  0x25   :  { %s568_s17 = scalar_lea.hbm %s808_s3, 1024 }
  0x26   :  { %p569_p2 = scmp.ne.s32.totalorder %s808_s3, %s568_s17  ;;  %p572_p3 = scmp.lt.u32.totalorder %s568_s17, %s808_s3 }
  0x28   :  { %p574_p4 = pnand %p572_p3, %p569_p2 }
  0x2a   :  { %577 = shalt.err (!%p574_p4)
}
  0x2b   :  { %s578_s25 = scalar_lea.vmem %s48_s26, 1024  ;;  %p583_p6 = scmp.lt.s32.totalorder %s48_s26, %s48_s26 }
  0x2c   :  { %p579_p5 = scmp.ne.s32.totalorder %s48_s26, %s578_s25  ;;  %p584_p7 = scmp.lt.s32.totalorder %s578_s25, %s578_s25 }
  0x2e   :  { %p585_p8 = por %p584_p7, %p583_p6 }
  0x30   :  { %p586_p9 = pnand %p585_p8, %p579_p5 }
  0x32   :  { %589 = shalt.err (!%p586_p9)
}
  0x33   :  { %53 = dma.hbm_to_vmem [thread:$0]  %s808_s3, 1024, %s48_s26, [#allocation6], %s643_s19, %s643_s19, %s644_s20  }
  0x34   :  { %s647_s27 = smov [#allocation8]   ;;  %s590_s11 = scalar_lea.hbm %s810_s5, 1024 }
  0x35   :  { %s61_s28 = sshll.u32 %s647_s27, 4  ;;  %p591_p10 = scmp.ne.s32.totalorder %s810_s5, %s590_s11  ;;  %s62_s28 = int_to_ptr.vmem [resolvable:$true] %s61_s28 }
  0x36   :  { %p594_p11 = scmp.lt.u32.totalorder %s590_s11, %s810_s5 }
  0x38   :  { %p596_p12 = pnand %p594_p11, %p591_p10 }
  0x3a   :  { %599 = shalt.err (!%p596_p12)
}
  0x3b   :  { %s600_s14 = scalar_lea.vmem %s62_s28, 1024  ;;  %p605_p0 = scmp.lt.s32.totalorder %s62_s28, %s62_s28 }
  0x3c   :  { %p601_p13 = scmp.ne.s32.totalorder %s62_s28, %s600_s14  ;;  %p606_p1 = scmp.lt.s32.totalorder %s600_s14, %s600_s14 }
  0x3e   :  { %p607_p2 = por %p606_p1, %p605_p0 }
  0x40   :  { %p608_p3 = pnand %p607_p2, %p601_p13 }
  0x42   :  { %611 = shalt.err (!%p608_p3)
}
  0x43   :  { %67 = dma.hbm_to_vmem [thread:$0]  %s810_s5, 1024, %s62_s28, [#allocation9], %s643_s19, %s643_s19, %s644_s20  }
  0x44   :  { %634 = dma.done.wait [#allocation3], 128  }
  0x45   :  { %635 = vsyncadd [#allocation3], 4294967168 }
  0x46   :  { %636 = dma.done.wait [#allocation6], 1152  }
  0x47   :  { %637 = vsyncadd [#allocation6], 4294966144 }
  0x48   :  { %638 = dma.done.wait [#allocation9], 1024  }
  0x49   :  { %639 = vsyncadd [#allocation9], 4294966272  ;;  %v648_v0 = vmov 0.0   ;;  %vm649_vm0 = vmmov 0   ;;  %v507_v1 = vld [vmem:[#allocation5] sm:$0xff]   ;;  %v87_v2 = vld [vmem:[#allocation2] sm:$0xff] }
  0x4a   :  { %452 = vmatprep.subr.bf16.mxu0 %v648_v0  ;;  %454 = vmatprep.mubr.msk.bf16.mxu0 %vm649_vm0, %v648_v0  ;;  %v88_v3 = vpack.c.bf16 %v87_v2, %v87_v2  ;;  %vm104_vm1 = vcmask 130048   ;;  %v508_v4 = vld [vmem:[#allocation7] sm:$0xff]   ;;  %v509_v5 = vld [vmem:[#allocation7 + $0x8] sm:$0xff]   ;;  %v510_v6 = vld [vmem:[#allocation7 + $0x10] sm:$0xff]   ;;  %s650_s22 = smov [#allocation10]  }
  0x4b   :  { %458 = vmatprep.subr.bf16.mxu1 %v648_v0  ;;  %474 = vmatprep.mubr.msk.bf16.mxu1 %vm649_vm0, %v648_v0  ;;  %v511_v7 = vld [vmem:[#allocation7 + $0x18] sm:$0xff]   ;;  %v512_v8 = vld [vmem:[#allocation7 + $0x20] sm:$0xff]   ;;  %v513_v9 = vld [vmem:[#allocation7 + $0x28] sm:$0xff]   ;;  %s398_s23 = sshll.u32 %s650_s22, 4  ;;  %s399_s23 = int_to_ptr.vmem [resolvable:$true] %s398_s23 }
  0x4c   :  { %453 = vmatpush3.bf16.msra.mxu0 %v507_v1  ;;  %459 = vmatpush3.bf16.msra.mxu1 %v508_v4  ;;  %v514_v10 = vld [vmem:[#allocation7 + $0x30] sm:$0xff]   ;;  %v515_v11 = vld [vmem:[#allocation7 + $0x38] sm:$0xff]   ;;  %v516_v12 = vld [vmem:[#allocation8] sm:$0xff]   ;;  %p617_p5 = scmp.lt.s32.totalorder %s399_s23, %s399_s23 }
  0x4d   :  { %478 = vmatprep.subr.bf16.mxu0 %v648_v0  ;;  %460 = vmatprep.subr.bf16.mxu1 %v648_v0  ;;  %v517_v13 = vld [vmem:[#allocation8 + $0x8] sm:$0xff]   ;;  %v518_v14 = vld [vmem:[#allocation8 + $0x10] sm:$0xff]   ;;  %v519_v15 = vld [vmem:[#allocation8 + $0x18] sm:$0xff]  }
  0x4e   :  { %v520_v16 = vld [vmem:[#allocation8 + $0x20] sm:$0xff]   ;;  %v521_v17 = vld [vmem:[#allocation8 + $0x28] sm:$0xff]   ;;  %v409_v18 = vld [vmem:[%s807_s2] ss:$0 sm:$0xff] }
  0x4f   :  { %455 = vmatmul.mubr.msk.bf16.vlgmr.msra.gmra.mrb[0].mxu0 %vm104_vm1, %v88_v3  ;;  %v522_v26 = vld [vmem:[#allocation8 + $0x30] sm:$0xff]   ;;  %v523_v27 = vld [vmem:[#allocation8 + $0x38] sm:$0xff]  }
  0x50   :  { %494 = vmatprep.mubr.msk.bf16.mxu0 %vm649_vm0, %v648_v0  ;;  %461 = vmatpush3.bf16.msra.mxu1 %v509_v5  ;;  %v412_v28 = vld [vmem:[%s809_s4] ss:$0 sm:$0xff] }
  0x51   :  { %462 = vmatprep.subr.bf16.mxu1 %v648_v0  ;;  %479 = vmatpush3.bf16.msra.mxu0 %v516_v12  ;;  %v421_v36 = vld [vmem:[%s811_s6] ss:$0 sm:$0xff]  ;;  %s612_s6 = scalar_lea.vmem %s399_s23, 64 }
  0x52   :  { %480 = vmatprep.subr.bf16.mxu0 %v648_v0  ;;  %v430_v38 = vld [vmem:[%s812_s7] ss:$0 sm:$0xff]  ;;  %p613_p4 = scmp.ne.s32.totalorder %s399_s23, %s612_s6  ;;  %p618_p6 = scmp.lt.s32.totalorder %s612_s6, %s612_s6 }
  0x53   :  { %v431_v42 = vld [vmem:[%s813_s8] ss:$0 sm:$0xff] }
  0x54   :  { %463 = vmatpush3.bf16.msra.mxu1 %v510_v6  ;;  %p619_p7 = por %p618_p6, %p617_p5 }
  0x55   :  { %464 = vmatprep.subr.bf16.mxu1 %v648_v0  ;;  %481 = vmatpush3.bf16.msra.mxu0 %v517_v13 }
  0x56   :  { %482 = vmatprep.subr.bf16.mxu0 %v648_v0  ;;  %p620_p8 = pnand %p619_p7, %p613_p4 }
  0x58   :  { %465 = vmatpush3.bf16.msra.mxu1 %v511_v7 }
  0x59   :  { %466 = vmatprep.subr.bf16.mxu1 %v648_v0  ;;  %483 = vmatpush3.bf16.msra.mxu0 %v518_v14 }
  0x5a   :  { %484 = vmatprep.subr.bf16.mxu0 %v648_v0 }
  0x5c   :  { %467 = vmatpush3.bf16.msra.mxu1 %v512_v8 }
  0x5d   :  { %468 = vmatprep.subr.bf16.mxu1 %v648_v0  ;;  %485 = vmatpush3.bf16.msra.mxu0 %v519_v15 }
  0x5e   :  { %486 = vmatprep.subr.bf16.mxu0 %v648_v0 }
  0x60   :  { %469 = vmatpush3.bf16.msra.mxu1 %v513_v9 }
  0x61   :  { %470 = vmatprep.subr.bf16.mxu1 %v648_v0  ;;  %487 = vmatpush3.bf16.msra.mxu0 %v520_v16 }
  0x62   :  { %488 = vmatprep.subr.bf16.mxu0 %v648_v0 }
  0x64   :  { %471 = vmatpush3.bf16.msra.mxu1 %v514_v10 }
  0x65   :  { %472 = vmatprep.subr.bf16.mxu1 %v648_v0  ;;  %489 = vmatpush3.bf16.msra.mxu0 %v521_v17 }
  0x66   :  { %490 = vmatprep.subr.bf16.mxu0 %v648_v0 }
  0x68   :  { %473 = vmatpush3.bf16.msra.mxu1 %v515_v11 }
  0x69   :  { %491 = vmatpush3.bf16.msra.mxu0 %v522_v26 }
  0x6a   :  { %492 = vmatprep.subr.bf16.mxu0 %v648_v0 }
  0x6d   :  { %493 = vmatpush3.bf16.msra.mxu0 %v523_v27 }
 0x122   :  { %v142_v19 = vpop.f32.mrb[0].mxu0 }
 0x123   :  { %v143_v20 = vadd.f32 %v409_v18, %v142_v19  ;;  %v456_v21 = vpop.f32.mrb[1].mxu0 }
 0x124   :  { %v145_v22 = vpop.f32.mrb[2].mxu0 }
 0x125   :  { %v148_v23 = vmax.f32 %v143_v20, 0.0  ;;  %v457_v24 = vpop.f32.mrb[3].mxu0 }
 0x127   :  { %v149_v25 = vpack.c.bf16 %v148_v23, %v148_v23 }
 0x129   :  { %475 = vmatmul.mubr.bf16.vlgmr.msra.gmra.mrb[0].mxu1 %v149_v25 }
 0x1fc   :  { %v255_v29 = vpop.f32.mrb[0].mxu1 }
 0x1fd   :  { %v256_v30 = vadd.f32 %v412_v28, %v255_v29  ;;  %v476_v31 = vpop.f32.mrb[1].mxu1 }
 0x1fe   :  { %v258_v32 = vpop.f32.mrb[2].mxu1 }
 0x1ff   :  { %v261_v33 = vmax.f32 %v256_v30, 0.0  ;;  %v477_v34 = vpop.f32.mrb[3].mxu1 }
 0x201   :  { %v262_v35 = vpack.c.bf16 %v261_v33, %v261_v33 }
 0x203   :  { %495 = vmatmul.mubr.bf16.vlgmr.msra.gmra.mrb[4].mxu0 %v262_v35 }
 0x2d6   :  { %v368_v37 = vpop.f32.mrb[4].mxu0 }
 0x2d7   :  { %v369_v39 = vadd.f32 %v421_v36, %v368_v37  ;;  %v496_v40 = vpop.f32.mrb[5].mxu0 }
 0x2d8   :  { %v371_v41 = vpop.f32.mrb[6].mxu0 }
 0x2d9   :  { %v381_v43 = vmax.f32 %v369_v39, %v430_v38  ;;  %v497_v44 = vpop.f32.mrb[7].mxu0 }
 0x2db   :  { %v389_v45 = vmin.f32 %v381_v43, %v431_v42 }
 0x2dd   :  { %v390_v46 = vpack.c.bf16 %v389_v45, %v389_v45 }
 0x2df   :  { %391 = vst [vmem:[#allocation10] sm:$0xf] %v390_v46 }
 0x2e0   :  { %623 = shalt.err (!%p620_p8)
}
 0x2e1   :  { %s624_s0 = scalar_lea.hbm %s814_s9, 64 }
 0x2e2   :  { %p625_p9 = scmp.ne.s32.totalorder %s814_s9, %s624_s0  ;;  %p628_p10 = scmp.lt.u32.totalorder %s624_s0, %s814_s9 }
 0x2e4   :  { %p630_p11 = pnand %p628_p10, %p625_p9 }
 0x2e6   :  { %633 = shalt.err (!%p630_p11)
}
 0x2e7   :  { %401 = dma.vmem_to_hbm [thread:$0]  %s399_s23, 64, %s814_s9, [#allocation4]  }
 0x2e8   :  { %640 = dma.done.wait [#allocation4], 64  }
 0x2e9   :  { %641 = vsyncadd [#allocation4], 4294967232 }
 0x2ea   :  { %405 = vsyncpa [#allocation3], 1 }
 0x2eb   :  { %406 = vsyncpa [#allocation6], 1 }
 0x2ec   :  { %407 = vsyncpa [#allocation9], 1 }
 0x2ed   :  { %408 = vsyncpa [#allocation4], 1 }

// kernel: tpu_custom_call.1
= control target key start
LH: loop header
LB: loop body
LE: loop exit
PB: predicated region body
PF: predicated region fallthrough
CT: control target
= control target key end

     0   :  { %14 = vsyncpa [#allocation3], 0  ;;  %s805_s0 = inlined_call_operand.hbm [shape: f32[8,16], index: 0, kind: input, shape index: {}]   ;;  %s806_s1 = inlined_call_operand.hbm [shape: bf16[16,128], index: 1, kind: input, shape index: {}]   ;;  %s807_s2 = inlined_call_operand.vmem [shape: f32[1,128], index: 2, kind: input, shape index: {}]   ;;  %s808_s3 = inlined_call_operand.hbm [shape: bf16[128,128], index: 3, kind: input, shape index: {}]   ;;  %s809_s4 = inlined_call_operand.vmem [shape: f32[1,128], index: 4, kind: input, shape index: {}]   ;;  %s810_s5 = inlined_call_operand.hbm [shape: bf16[128,128], index: 5, kind: input, shape index: {}]   ;;  %s811_s6 = inlined_call_operand.vmem [shape: f32[1,128], index: 6, kind: input, shape index: {}]   ;;  %s812_s7 = inlined_call_operand.vmem [shape: f32[1,128], index: 7, kind: input, shape index: {}]   ;;  %s813_s8 = inlined_call_operand.vmem [shape: f32[1,128], index: 8, kind: input, shape index: {}]   ;;  %s814_s9 = inlined_call_operand.hbm [shape: bf16[8,128], index: 9, kind: output, shape index: {}]  }
   0x1   :  { %15 = vsyncpa [#allocation6], 0 }
   0x2   :  { %16 = vsyncpa [#allocation9], 0 }
   0x3   :  { %17 = vsyncpa [#allocation4], 0  ;;  %s642_s30 = smov [#allocation5]   ;;  %s524_s13 = scalar_lea.hbm %s806_s1, 128 }
   0x4   :  { %s33_s10 = sshll.u32 %s642_s30, 4  ;;  %p525_p0 = scmp.ne.s32.totalorder %s806_s1, %s524_s13  ;;  %s34_s10 = int_to_ptr.vmem [resolvable:$true] %s33_s10 }
   0x5   :  { %p528_p1 = scmp.lt.u32.totalorder %s524_s13, %s806_s1 }
   0x7   :  { %p530_p2 = pnand %p528_p1, %p525_p0 }
   0x9   :  { %533 = shalt.err (!%p530_p2)
}
   0xa   :  { %s534_s18 = scalar_lea.vmem %s34_s10, 128  ;;  %p539_p4 = scmp.lt.s32.totalorder %s34_s10, %s34_s10 }
   0xb   :  { %p535_p3 = scmp.ne.s32.totalorder %s34_s10, %s534_s18  ;;  %p540_p5 = scmp.lt.s32.totalorder %s534_s18, %s534_s18 }
   0xd   :  { %p541_p6 = por %p540_p5, %p539_p4 }
   0xf   :  { %p542_p7 = pnand %p541_p6, %p535_p3 }
  0x11   :  { %545 = shalt.err (!%p542_p7)
}
  0x12   :  { %s643_s19 = smov 64   ;;  %s644_s20 = smov 4  }
  0x13   :  { %39 = dma.hbm_to_vmem [thread:$0]  %s806_s1, 128, %s34_s10, [#allocation6], %s643_s19, %s643_s19, %s644_s20  }
  0x14   :  { %s645_s23 = smov [#allocation2]   ;;  %s646_s25 = smov [#allocation7]  }
  0x15   :  { %s24_s24 = sshll.u32 %s645_s23, 4  ;;  %s47_s26 = sshll.u32 %s646_s25, 4  ;;  %s25_s24 = int_to_ptr.vmem [resolvable:$true] %s24_s24  ;;  %s48_s26 = int_to_ptr.vmem [resolvable:$true] %s47_s26 }
  0x16   :  { %s546_s29 = scalar_lea.hbm %s805_s0, 128 }
  0x17   :  { %p547_p8 = scmp.ne.s32.totalorder %s805_s0, %s546_s29  ;;  %p550_p9 = scmp.lt.u32.totalorder %s546_s29, %s805_s0 }
  0x19   :  { %p552_p10 = pnand %p550_p9, %p547_p8 }
  0x1b   :  { %555 = shalt.err (!%p552_p10)
}
  0x1c   :  { %s556_s1 = scalar_lea.vmem %s25_s24, 128  ;;  %p561_p12 = scmp.lt.s32.totalorder %s25_s24, %s25_s24 }
  0x1d   :  { %p557_p11 = scmp.ne.s32.totalorder %s25_s24, %s556_s1  ;;  %p562_p13 = scmp.lt.s32.totalorder %s556_s1, %s556_s1 }
  0x1f   :  { %p563_p0 = por %p562_p13, %p561_p12 }
  0x21   :  { %p564_p1 = pnand %p563_p0, %p557_p11 }
  0x23   :  { %567 = shalt.err (!%p564_p1)
}
  0x24   :  { %27 = dma.hbm_to_vmem [thread:$0]  %s805_s0, 128, %s25_s24, [#allocation3]  }
  0x25   :  { %s568_s17 = scalar_lea.hbm %s808_s3, 1024 }
  0x26   :  { %p569_p2 = scmp.ne.s32.totalorder %s808_s3, %s568_s17  ;;  %p572_p3 = scmp.lt.u32.totalorder %s568_s17, %s808_s3 }
  0x28   :  { %p574_p4 = pnand %p572_p3, %p569_p2 }
  0x2a   :  { %577 = shalt.err (!%p574_p4)
}
  0x2b   :  { %s578_s25 = scalar_lea.vmem %s48_s26, 1024  ;;  %p583_p6 = scmp.lt.s32.totalorder %s48_s26, %s48_s26 }
  0x2c   :  { %p579_p5 = scmp.ne.s32.totalorder %s48_s26, %s578_s25  ;;  %p584_p7 = scmp.lt.s32.totalorder %s578_s25, %s578_s25 }
  0x2e   :  { %p585_p8 = por %p584_p7, %p583_p6 }
  0x30   :  { %p586_p9 = pnand %p585_p8, %p579_p5 }
  0x32   :  { %589 = shalt.err (!%p586_p9)
}
  0x33   :  { %53 = dma.hbm_to_vmem [thread:$0]  %s808_s3, 1024, %s48_s26, [#allocation6], %s643_s19, %s643_s19, %s644_s20  }
  0x34   :  { %s647_s27 = smov [#allocation8]   ;;  %s590_s11 = scalar_lea.hbm %s810_s5, 1024 }
  0x35   :  { %s61_s28 = sshll.u32 %s647_s27, 4  ;;  %p591_p10 = scmp.ne.s32.totalorder %s810_s5, %s590_s11  ;;  %s62_s28 = int_to_ptr.vmem [resolvable:$true] %s61_s28 }
  0x36   :  { %p594_p11 = scmp.lt.u32.totalorder %s590_s11, %s810_s5 }
  0x38   :  { %p596_p12 = pnand %p594_p11, %p591_p10 }
  0x3a   :  { %599 = shalt.err (!%p596_p12)
}
  0x3b   :  { %s600_s14 = scalar_lea.vmem %s62_s28, 1024  ;;  %p605_p0 = scmp.lt.s32.totalorder %s62_s28, %s62_s28 }
  0x3c   :  { %p601_p13 = scmp.ne.s32.totalorder %s62_s28, %s600_s14  ;;  %p606_p1 = scmp.lt.s32.totalorder %s600_s14, %s600_s14 }
  0x3e   :  { %p607_p2 = por %p606_p1, %p605_p0 }
  0x40   :  { %p608_p3 = pnand %p607_p2, %p601_p13 }
  0x42   :  { %611 = shalt.err (!%p608_p3)
}
  0x43   :  { %67 = dma.hbm_to_vmem [thread:$0]  %s810_s5, 1024, %s62_s28, [#allocation9], %s643_s19, %s643_s19, %s644_s20  }
  0x44   :  { %634 = dma.done.wait [#allocation3], 128  }
  0x45   :  { %635 = vsyncadd [#allocation3], 4294967168 }
  0x46   :  { %636 = dma.done.wait [#allocation6], 1152  }
  0x47   :  { %637 = vsyncadd [#allocation6], 4294966144 }
  0x48   :  { %638 = dma.done.wait [#allocation9], 1024  }
  0x49   :  { %639 = vsyncadd [#allocation9], 4294966272  ;;  %v648_v0 = vmov 0.0   ;;  %vm649_vm0 = vmmov 0   ;;  %v507_v1 = vld [vmem:[#allocation5] sm:$0xff]   ;;  %v87_v2 = vld [vmem:[#allocation2] sm:$0xff] }
  0x4a   :  { %452 = vmatprep.subr.bf16.mxu0 %v648_v0  ;;  %454 = vmatprep.mubr.msk.bf16.mxu0 %vm649_vm0, %v648_v0  ;;  %v88_v3 = vpack.c.bf16 %v87_v2, %v87_v2  ;;  %vm104_vm1 = vcmask 130048   ;;  %v508_v4 = vld [vmem:[#allocation7] sm:$0xff]   ;;  %v509_v5 = vld [vmem:[#allocation7 + $0x8] sm:$0xff]   ;;  %v510_v6 = vld [vmem:[#allocation7 + $0x10] sm:$0xff]   ;;  %s650_s22 = smov [#allocation10]  }
  0x4b   :  { %458 = vmatprep.subr.bf16.mxu1 %v648_v0  ;;  %474 = vmatprep.mubr.msk.bf16.mxu1 %vm649_vm0, %v648_v0  ;;  %v511_v7 = vld [vmem:[#allocation7 + $0x18] sm:$0xff]   ;;  %v512_v8 = vld [vmem:[#allocation7 + $0x20] sm:$0xff]   ;;  %v513_v9 = vld [vmem:[#allocation7 + $0x28] sm:$0xff]   ;;  %s398_s23 = sshll.u32 %s650_s22, 4  ;;  %s399_s23 = int_to_ptr.vmem [resolvable:$true] %s398_s23 }
  0x4c   :  { %453 = vmatpush3.bf16.msra.mxu0 %v507_v1  ;;  %459 = vmatpush3.bf16.msra.mxu1 %v508_v4  ;;  %v514_v10 = vld [vmem:[#allocation7 + $0x30] sm:$0xff]   ;;  %v515_v11 = vld [vmem:[#allocation7 + $0x38] sm:$0xff]   ;;  %v516_v12 = vld [vmem:[#allocation8] sm:$0xff]   ;;  %p617_p5 = scmp.lt.s32.totalorder %s399_s23, %s399_s23 }
  0x4d   :  { %478 = vmatprep.subr.bf16.mxu0 %v648_v0  ;;  %460 = vmatprep.subr.bf16.mxu1 %v648_v0  ;;  %v517_v13 = vld [vmem:[#allocation8 + $0x8] sm:$0xff]   ;;  %v518_v14 = vld [vmem:[#allocation8 + $0x10] sm:$0xff]   ;;  %v519_v15 = vld [vmem:[#allocation8 + $0x18] sm:$0xff]  }
  0x4e   :  { %v520_v16 = vld [vmem:[#allocation8 + $0x20] sm:$0xff]   ;;  %v521_v17 = vld [vmem:[#allocation8 + $0x28] sm:$0xff]   ;;  %v409_v18 = vld [vmem:[%s807_s2] ss:$0 sm:$0xff] }
  0x4f   :  { %455 = vmatmul.mubr.msk.bf16.vlgmr.msra.gmra.mrb[0].mxu0 %vm104_vm1, %v88_v3  ;;  %v522_v26 = vld [vmem:[#allocation8 + $0x30] sm:$0xff]   ;;  %v523_v27 = vld [vmem:[#allocation8 + $0x38] sm:$0xff]  }
  0x50   :  { %494 = vmatprep.mubr.msk.bf16.mxu0 %vm649_vm0, %v648_v0  ;;  %461 = vmatpush3.bf16.msra.mxu1 %v509_v5  ;;  %v412_v28 = vld [vmem:[%s809_s4] ss:$0 sm:$0xff] }
  0x51   :  { %462 = vmatprep.subr.bf16.mxu1 %v648_v0  ;;  %479 = vmatpush3.bf16.msra.mxu0 %v516_v12  ;;  %v421_v36 = vld [vmem:[%s811_s6] ss:$0 sm:$0xff]  ;;  %s612_s6 = scalar_lea.vmem %s399_s23, 64 }
  0x52   :  { %480 = vmatprep.subr.bf16.mxu0 %v648_v0  ;;  %v430_v38 = vld [vmem:[%s812_s7] ss:$0 sm:$0xff]  ;;  %p613_p4 = scmp.ne.s32.totalorder %s399_s23, %s612_s6  ;;  %p618_p6 = scmp.lt.s32.totalorder %s612_s6, %s612_s6 }
  0x53   :  { %v431_v42 = vld [vmem:[%s813_s8] ss:$0 sm:$0xff] }
  0x54   :  { %463 = vmatpush3.bf16.msra.mxu1 %v510_v6  ;;  %p619_p7 = por %p618_p6, %p617_p5 }
  0x55   :  { %464 = vmatprep.subr.bf16.mxu1 %v648_v0  ;;  %481 = vmatpush3.bf16.msra.mxu0 %v517_v13 }
  0x56   :  { %482 = vmatprep.subr.bf16.mxu0 %v648_v0  ;;  %p620_p8 = pnand %p619_p7, %p613_p4 }
  0x58   :  { %465 = vmatpush3.bf16.msra.mxu1 %v511_v7 }
  0x59   :  { %466 = vmatprep.subr.bf16.mxu1 %v648_v0  ;;  %483 = vmatpush3.bf16.msra.mxu0 %v518_v14 }
  0x5a   :  { %484 = vmatprep.subr.bf16.mxu0 %v648_v0 }
  0x5c   :  { %467 = vmatpush3.bf16.msra.mxu1 %v512_v8 }
  0x5d   :  { %468 = vmatprep.subr.bf16.mxu1 %v648_v0  ;;  %485 = vmatpush3.bf16.msra.mxu0 %v519_v15 }
  0x5e   :  { %486 = vmatprep.subr.bf16.mxu0 %v648_v0 }
  0x60   :  { %469 = vmatpush3.bf16.msra.mxu1 %v513_v9 }
  0x61   :  { %470 = vmatprep.subr.bf16.mxu1 %v648_v0  ;;  %487 = vmatpush3.bf16.msra.mxu0 %v520_v16 }
  0x62   :  { %488 = vmatprep.subr.bf16.mxu0 %v648_v0 }
  0x64   :  { %471 = vmatpush3.bf16.msra.mxu1 %v514_v10 }
  0x65   :  { %472 = vmatprep.subr.bf16.mxu1 %v648_v0  ;;  %489 = vmatpush3.bf16.msra.mxu0 %v521_v17 }
  0x66   :  { %490 = vmatprep.subr.bf16.mxu0 %v648_v0 }
  0x68   :  { %473 = vmatpush3.bf16.msra.mxu1 %v515_v11 }
  0x69   :  { %491 = vmatpush3.bf16.msra.mxu0 %v522_v26 }
  0x6a   :  { %492 = vmatprep.subr.bf16.mxu0 %v648_v0 }
  0x6d   :  { %493 = vmatpush3.bf16.msra.mxu0 %v523_v27 }
 0x122   :  { %v142_v19 = vpop.f32.mrb[0].mxu0 }
 0x123   :  { %v143_v20 = vadd.f32 %v409_v18, %v142_v19  ;;  %v456_v21 = vpop.f32.mrb[1].mxu0 }
 0x124   :  { %v145_v22 = vpop.f32.mrb[2].mxu0 }
 0x125   :  { %v148_v23 = vmax.f32 %v143_v20, 0.0  ;;  %v457_v24 = vpop.f32.mrb[3].mxu0 }
 0x127   :  { %v149_v25 = vpack.c.bf16 %v148_v23, %v148_v23 }
 0x129   :  { %475 = vmatmul.mubr.bf16.vlgmr.msra.gmra.mrb[0].mxu1 %v149_v25 }
 0x1fc   :  { %v255_v29 = vpop.f32.mrb[0].mxu1 }
 0x1fd   :  { %v256_v30 = vadd.f32 %v412_v28, %v255_v29  ;;  %v476_v31 = vpop.f32.mrb[1].mxu1 }
 0x1fe   :  { %v258_v32 = vpop.f32.mrb[2].mxu1 }
 0x1ff   :  { %v261_v33 = vmax.f32 %v256_v30, 0.0  ;;  %v477_v34 = vpop.f32.mrb[3].mxu1 }
 0x201   :  { %v262_v35 = vpack.c.bf16 %v261_v33, %v261_v33 }
 0x203   :  { %495 = vmatmul.mubr.bf16.vlgmr.msra.gmra.mrb[4].mxu0 %v262_v35 }
 0x2d6   :  { %v368_v37 = vpop.f32.mrb[4].mxu0 }
 0x2d7   :  { %v369_v39 = vadd.f32 %v421_v36, %v368_v37  ;;  %v496_v40 = vpop.f32.mrb[5].mxu0 }
 0x2d8   :  { %v371_v41 = vpop.f32.mrb[6].mxu0 }
 0x2d9   :  { %v381_v43 = vmax.f32 %v369_v39, %v430_v38  ;;  %v497_v44 = vpop.f32.mrb[7].mxu0 }
 0x2db   :  { %v389_v45 = vmin.f32 %v381_v43, %v431_v42 }
 0x2dd   :  { %v390_v46 = vpack.c.bf16 %v389_v45, %v389_v45 }
 0x2df   :  { %391 = vst [vmem:[#allocation10] sm:$0xf] %v390_v46 }
 0x2e0   :  { %623 = shalt.err (!%p620_p8)
}
 0x2e1   :  { %s624_s0 = scalar_lea.hbm %s814_s9, 64 }
 0x2e2   :  { %p625_p9 = scmp.ne.s32.totalorder %s814_s9, %s624_s0  ;;  %p628_p10 = scmp.lt.u32.totalorder %s624_s0, %s814_s9 }
 0x2e4   :  { %p630_p11 = pnand %p628_p10, %p625_p9 }
 0x2e6   :  { %633 = shalt.err (!%p630_p11)
}
 0x2e7   :  { %401 = dma.vmem_to_hbm [thread:$0]  %s399_s23, 64, %s814_s9, [#allocation4]  }
 0x2e8   :  { %640 = dma.done.wait [#allocation4], 64  }
 0x2e9   :  { %641 = vsyncadd [#allocation4], 4294967232 }
 0x2ea   :  { %405 = vsyncpa [#allocation3], 1 }
 0x2eb   :  { %406 = vsyncpa [#allocation6], 1 }
 0x2ec   :  { %407 = vsyncpa [#allocation9], 1 }
 0x2ed   :  { %408 = vsyncpa [#allocation4], 1 }

</bundles_post_ra>
